<compile_context>
chip_gen: v7x
topology: tpu7x:2x2x1
jax: 0.10.0
libtpu: 0.0.40
codegen_flags: <defaults>
</compile_context>

<pallas_src>
import functools

import jax
import jax.numpy as jnp
from jax import lax
from jax.experimental import pallas as pl
from jax.experimental.pallas import tpu as pltpu


def _mil_block_kernel(x_ref, wi_ref, bi_ref, wq_ref, bq_ref, wf_ref, bf_ref,
                      cls_ref, pred_ref, a_ref, b_ref):
    """Processes one block of BB bags (one grid step)."""
    bb, num_classes, n = cls_ref.shape            # outputs are transposed (C, N)

    x2 = x_ref[...]                               # (BB*N, D)  bf16
    wi = wi_ref[...]                              # (D, C)     bf16
    wq = wq_ref[...]                              # (D, L)     bf16
    bi = bi_ref[...]                              # (1, C)     f32
    bq = bq_ref[...]                              # (1, L)     f32
    wf = wf_ref[...]                              # (C_out, C_in, D) f32 (torch Conv1d layout)
    bf_t = bf_ref[...]                            # (C, 1)     f32

    # ---- shared-weight matmuls, fused over the whole bag block (MXU M=BB*N) ----
    cls_all = jnp.dot(x2, wi, preferred_element_type=jnp.float32) + bi   # (BB*N, C)
    q_all = jnp.dot(x2, wq, preferred_element_type=jnp.float32) + bq     # (BB*N, L)

    lq = q_all.shape[1]
    scale = 1.0 / jnp.sqrt(jnp.float32(lq))

    # ---- per-bag attention math (BB is small & static: fully unrolled) --------
    for b in range(bb):
        lo = b * n
        cls_b = cls_all[lo:lo + n, :]             # (N, C) f32
        q_b = q_all[lo:lo + n, :]                 # (N, L) f32
        x_b = x2[lo:lo + n, :]                    # (N, D) bf16

        # Transposed (C, N) layout: instances on lanes -> dense reductions and
        # lane-dense output stores.
        cls_t = cls_b.T                           # (C, N)
        cls_ref[b] = cls_t

        # Critical instance per class: first max over instances (torch argmax).
        maxv = jnp.max(cls_t, axis=-1, keepdims=True)            # (C, 1)
        iota = lax.broadcasted_iota(jnp.int32, cls_t.shape, 1)   # (C, N)
        masked = jnp.where(cls_t >= maxv, iota, n)
        m_idx = jnp.min(masked, axis=-1, keepdims=True)          # (C, 1)
        onehot = (iota == m_idx).astype(jnp.float32)             # (C, N)

        # q_max = rows of Q at the critical instances, gathered via one-hot matmul.
        q_max = jnp.dot(onehot, q_b, preferred_element_type=jnp.float32)  # (C, L)

        # Attention logits already transposed: logits_t[c, n] = q_max[c] . q[n].
        logits_t = lax.dot_general(q_max, q_b, (((1,), (1,)), ((), ())),
                                   preferred_element_type=jnp.float32) * scale
        lm = jnp.max(logits_t, axis=-1, keepdims=True)           # softmax over
        e = jnp.exp(logits_t - lm)                               # instances =
        a_t = e / jnp.sum(e, axis=-1, keepdims=True)             # lane reduction
        a_ref[b] = a_t                                           # (C, N)

        # Bag embedding B = A^T @ V  (V = feats, passing_v=False).
        b_mat = jnp.dot(a_t.astype(jnp.bfloat16), x_b,
                        preferred_element_type=jnp.float32)      # (C, D)
        b_ref[b, 0] = b_mat

        # fcc: Conv1d(C, C, kernel_size=D) == full contraction over (C_in, D).
        # M=1, so do it on the VPU: broadcast multiply + lane reductions.
        prod = wf * b_mat[None, :, :]                            # (C_out, C_in, D)
        s = jnp.sum(prod, axis=-1)                               # (C_out, C_in)
        pred_ref[b] = jnp.sum(s, axis=-1, keepdims=True) + bf_t  # (C_out, 1)


@functools.partial(jax.jit, static_argnames=("block_bags",))
def batch_mil_net_forward(x, wi, bi, wq, bq, wf, bf, *, block_bags=4):
    """x: (batch, N, D) f32.  wf: torch Conv1d layout (C_out, C_in, D).
    Returns (classes, prediction_bags, As, Bs) stacked over the batch, matching
    BatchMILNet.forward + torch.stack semantics."""
    bsz, n, d = x.shape
    num_classes = wi.shape[1]
    lq = wq.shape[1]

    # Bag-blocking: BB bags per grid step (pad the batch to a multiple of BB).
    bb = min(block_bags, bsz)
    padded = pl.cdiv(bsz, bb) * bb
    if padded != bsz:
        x = jnp.concatenate(
            [x, jnp.zeros((padded - bsz, n, d), x.dtype)], axis=0)

    # bf16 MXU streams (f32 accumulation in-kernel); halves the HBM bytes for x.
    x2 = x.reshape(padded * n, d).astype(jnp.bfloat16)
    wi_b = wi.astype(jnp.bfloat16)
    wq_b = wq.astype(jnp.bfloat16)
    bf_t = bf.reshape(1, num_classes).T                      # (C, 1)

    grid = (padded // bb,)

    out_shape = (
        jax.ShapeDtypeStruct((padded, num_classes, n), jnp.float32),    # classes^T
        jax.ShapeDtypeStruct((padded, num_classes, 1), jnp.float32),    # pred^T
        jax.ShapeDtypeStruct((padded, num_classes, n), jnp.float32),    # A^T
        jax.ShapeDtypeStruct((padded, 1, num_classes, d), jnp.float32), # B
    )
    in_specs = [
        pl.BlockSpec((bb * n, d), lambda i: (i, 0)),                    # x (bag block)
        pl.BlockSpec((d, num_classes), lambda i: (0, 0)),               # wi
        pl.BlockSpec((1, num_classes), lambda i: (0, 0)),               # bi
        pl.BlockSpec((d, lq), lambda i: (0, 0)),                        # wq
        pl.BlockSpec((1, lq), lambda i: (0, 0)),                        # bq
        pl.BlockSpec((num_classes, num_classes, d), lambda i: (0, 0, 0)),  # wf (c_out,c_in,D)
        pl.BlockSpec((num_classes, 1), lambda i: (0, 0)),               # bf^T
    ]
    out_specs = (
        pl.BlockSpec((bb, num_classes, n), lambda i: (i, 0, 0)),
        pl.BlockSpec((bb, num_classes, 1), lambda i: (i, 0, 0)),
        pl.BlockSpec((bb, num_classes, n), lambda i: (i, 0, 0)),
        pl.BlockSpec((bb, 1, num_classes, d), lambda i: (i, 0, 0, 0)),
    )

    flops = padded * (2 * n * d * (num_classes + lq)        # classes + Q
                      + 4 * num_classes * n * lq            # q_max gather + logits
                      + 2 * num_classes * n * d             # A^T @ V
                      + 2 * num_classes * num_classes * d)  # fcc
    bytes_accessed = (x2.size * 2 + (wi.size + wq.size) * 2
                      + (bi.size + bq.size + wf.size + bf.size) * 4
                      + padded * (2 * num_classes * n + num_classes
                                  + num_classes * d) * 4)
    cost = pl.CostEstimate(flops=int(flops),
                           transcendentals=int(padded * n * num_classes),
                           bytes_accessed=int(bytes_accessed))

    cls_t, pred_t, a_t, bs = pl.pallas_call(
        _mil_block_kernel,
        out_shape=out_shape,
        grid=grid,
        in_specs=in_specs,
        out_specs=out_specs,
        compiler_params=pltpu.CompilerParams(
            dimension_semantics=("parallel",)),   # shards bag blocks across TCs (v7x)
        cost_estimate=cost,
    )(x2, wi_b, bi, wq_b, bq, wf, bf_t)

    # Layout plumbing only: back from the lane-dense transposed kernel layout.
    classes = jnp.swapaxes(cls_t, 1, 2)[:bsz]       # (bsz, N, C)
    prediction_bags = jnp.swapaxes(pred_t, 1, 2)[:bsz]  # (bsz, 1, C)
    As = jnp.swapaxes(a_t, 1, 2)[:bsz]              # (bsz, N, C)
    Bs = bs[:bsz]                                   # (bsz, 1, C, D)
    return classes, prediction_bags, As, Bs


def _reference_forward(x, wi, bi, wq, bq, wf, bf):
    """Pure-JAX reference of the same math (vmapped over bags), mirroring the
    kernel's bf16 MXU inputs with f32 accumulation."""
    wi_b = wi.astype(jnp.bfloat16)
    wq_b = wq.astype(jnp.bfloat16)

    def one_bag(xb):
        xb_b = xb.astype(jnp.bfloat16)
        classes = jnp.dot(xb_b, wi_b, preferred_element_type=jnp.float32) + bi  # (N, C)
        q = jnp.dot(xb_b, wq_b, preferred_element_type=jnp.float32) + bq        # (N, L)
        m_idx = jnp.argmax(classes, axis=0)                      # (C,)
        q_max = q[m_idx]                                         # (C, L)
        logits = (q @ q_max.T) / jnp.sqrt(jnp.float32(q.shape[1]))
        a = jax.nn.softmax(logits, axis=0)                       # (N, C)
        bmat = jnp.dot(a.T.astype(jnp.bfloat16), xb_b,
                       preferred_element_type=jnp.float32)       # (C, D)
        pred = bf + jnp.einsum("cd,kcd->k", bmat, wf)[None, :]   # (1, C)
        return classes, pred, a, bmat[None]

    return jax.vmap(one_bag)(x)


if __name__ == "__main__":
    # Small deterministic problem: 6 bags (padded to 2 grid steps of 4),
    # 8 instances/bag, 32-dim features, 2 classes, q-dim 16.
    BATCH, N, D, C, L = 6, 8, 32, 2, 16

    key = jax.random.PRNGKey(0)
    k = jax.random.split(key, 7)
    wi = jax.random.normal(k[0], (D, C), jnp.float32) * 0.1      # IClassifier fc
    bi = jax.random.normal(k[1], (1, C), jnp.float32) * 0.1
    wq = jax.random.normal(k[2], (D, L), jnp.float32) * 0.1      # BClassifier q
    bq = jax.random.normal(k[3], (1, L), jnp.float32) * 0.1
    wf = jax.random.normal(k[4], (C, C, D), jnp.float32) * 0.1   # fcc, torch layout (c_out, c_in, D)
    bf = jax.random.normal(k[5], (1, C), jnp.float32) * 0.1
    x = jax.random.normal(k[6], (BATCH, N, D), jnp.float32)      # batch of bags

    outs = batch_mil_net_forward(x, wi, bi, wq, bq, wf, bf, block_bags=4)
    outs = jax.block_until_ready(outs)
    classes, prediction_bags, As, Bs = outs

    # Sanity check against pure-JAX reference.
    ref = _reference_forward(x, wi, bi, wq, bq, wf, bf)
    for got, want in zip(outs, ref):
        assert got.shape == want.shape, (got.shape, want.shape)
        assert jnp.allclose(got, want, rtol=1e-2, atol=1e-2), \
            float(jnp.max(jnp.abs(got - want)))

    assert classes.shape == (BATCH, N, C)
    assert prediction_bags.shape == (BATCH, 1, C)
    assert As.shape == (BATCH, N, C)
    assert Bs.shape == (BATCH, 1, C, D)

    print("KERNEL_OK")
</pallas_src>

<mosaic_0001>
module attributes {stable_mosaic.version = 11 : i64} {
  func.func @_mil_block_kernel(%arg0: i32, %arg1: memref<32x32xbf16, #tpu.memory_space<vmem>>, %arg2: memref<32x2xbf16, #tpu.memory_space<vmem>>, %arg3: memref<1x2xf32, #tpu.memory_space<vmem>>, %arg4: memref<32x16xbf16, #tpu.memory_space<vmem>>, %arg5: memref<1x16xf32, #tpu.memory_space<vmem>>, %arg6: memref<2x2x32xf32, #tpu.memory_space<vmem>>, %arg7: memref<2x1xf32, #tpu.memory_space<vmem>>, %arg8: memref<4x2x8xf32, #tpu.memory_space<vmem>>, %arg9: memref<4x2x1xf32, #tpu.memory_space<vmem>>, %arg10: memref<4x2x8xf32, #tpu.memory_space<vmem>>, %arg11: memref<4x1x2x32xf32, #tpu.memory_space<vmem>>) attributes {dimension_semantics = [#tpu.dimension_semantics<parallel>], iteration_bounds = array<i64: 2>, scalar_prefetch = 0 : i64, scratch_operands = 0 : i64, tpu.core_type = #tpu.core_type<tc>, window_params = [{transform_indices = @transform_0, window_bounds = array<i64: 32, 32>}, {pipeline_mode = #tpu.pipeline_mode<synchronous>, transform_indices = @transform_1, window_bounds = array<i64: 32, 2>}, {pipeline_mode = #tpu.pipeline_mode<synchronous>, transform_indices = @transform_2, window_bounds = array<i64: 1, 2>}, {pipeline_mode = #tpu.pipeline_mode<synchronous>, transform_indices = @transform_3, window_bounds = array<i64: 32, 16>}, {pipeline_mode = #tpu.pipeline_mode<synchronous>, transform_indices = @transform_4, window_bounds = array<i64: 1, 16>}, {pipeline_mode = #tpu.pipeline_mode<synchronous>, transform_indices = @transform_5, window_bounds = array<i64: 2, 2, 32>}, {pipeline_mode = #tpu.pipeline_mode<synchronous>, transform_indices = @transform_6, window_bounds = array<i64: 2, 1>}, {transform_indices = @transform_7, window_bounds = array<i64: 4, 2, 8>}, {transform_indices = @transform_8, window_bounds = array<i64: 4, 2, 1>}, {transform_indices = @transform_9, window_bounds = array<i64: 4, 2, 8>}, {transform_indices = @transform_10, window_bounds = array<i64: 4, 1, 2, 32>}]} {
    %c0 = arith.constant 0 : index
    %c0_0 = arith.constant 0 : index
    %0 = vector.load %arg1[%c0, %c0_0] : memref<32x32xbf16, #tpu.memory_space<vmem>>, vector<32x32xbf16>
    %c0_1 = arith.constant 0 : index
    %c0_2 = arith.constant 0 : index
    %1 = vector.load %arg2[%c0_1, %c0_2] : memref<32x2xbf16, #tpu.memory_space<vmem>>, vector<32x2xbf16>
    %c0_3 = arith.constant 0 : index
    %c0_4 = arith.constant 0 : index
    %2 = vector.load %arg4[%c0_3, %c0_4] : memref<32x16xbf16, #tpu.memory_space<vmem>>, vector<32x16xbf16>
    %c0_5 = arith.constant 0 : index
    %c0_6 = arith.constant 0 : index
    %3 = vector.load %arg3[%c0_5, %c0_6] : memref<1x2xf32, #tpu.memory_space<vmem>>, vector<1x2xf32>
    %c0_7 = arith.constant 0 : index
    %c0_8 = arith.constant 0 : index
    %4 = vector.load %arg5[%c0_7, %c0_8] : memref<1x16xf32, #tpu.memory_space<vmem>>, vector<1x16xf32>
    %c0_9 = arith.constant 0 : index
    %c0_10 = arith.constant 0 : index
    %c0_11 = arith.constant 0 : index
    %5 = vector.load %arg6[%c0_9, %c0_10, %c0_11] : memref<2x2x32xf32, #tpu.memory_space<vmem>>, vector<2x2x32xf32>
    %c0_12 = arith.constant 0 : index
    %c0_13 = arith.constant 0 : index
    %6 = vector.load %arg7[%c0_12, %c0_13] : memref<2x1xf32, #tpu.memory_space<vmem>>, vector<2x1xf32>
    %cst = arith.constant dense<0.000000e+00> : vector<32x2xf32>
    %7 = tpu.matmul %0, %1, %cst {dimension_numbers = #tpu.dot_dimension_numbers<[1], [0], [0], [1], [0, 0, 1, 1], [], []>} : vector<32x32xbf16>, vector<32x2xbf16>, vector<32x2xf32> -> vector<32x2xf32>
    %8 = vector.broadcast %3 : vector<1x2xf32> to vector<32x2xf32>
    %9 = arith.addf %7, %8 : vector<32x2xf32>
    %cst_14 = arith.constant dense<0.000000e+00> : vector<32x16xf32>
    %10 = tpu.matmul %0, %2, %cst_14 {dimension_numbers = #tpu.dot_dimension_numbers<[1], [0], [0], [1], [0, 0, 1, 1], [], []>} : vector<32x32xbf16>, vector<32x16xbf16>, vector<32x16xf32> -> vector<32x16xf32>
    %11 = vector.broadcast %4 : vector<1x16xf32> to vector<32x16xf32>
    %12 = arith.addf %10, %11 : vector<32x16xf32>
    %cst_15 = arith.constant 1.600000e+01 : f32
    %13 = math.sqrt %cst_15 : f32
    %cst_16 = arith.constant 1.000000e+00 : f32
    %14 = arith.divf %cst_16, %13 : f32
    %15 = vector.extract_strided_slice %9 {offsets = [0, 0], sizes = [8, 2], strides = [1, 1]} : vector<32x2xf32> to vector<8x2xf32>
    %16 = vector.extract_strided_slice %12 {offsets = [0, 0], sizes = [8, 16], strides = [1, 1]} : vector<32x16xf32> to vector<8x16xf32>
    %17 = vector.extract_strided_slice %0 {offsets = [0, 0], sizes = [8, 32], strides = [1, 1]} : vector<32x32xbf16> to vector<8x32xbf16>
    %18 = tpu.transpose %15, [1, 0] : vector<8x2xf32> -> vector<2x8xf32>
    %c0_17 = arith.constant 0 : index
    %c0_18 = arith.constant 0 : index
    %c0_19 = arith.constant 0 : index
    %19 = vector.load %arg8[%c0_17, %c0_18, %c0_19] : memref<4x2x8xf32, #tpu.memory_space<vmem>>, vector<1x2x8xf32>
    %20 = vector.shape_cast %19 : vector<1x2x8xf32> to vector<2x8xf32>
    %21 = vector.shape_cast %18 : vector<2x8xf32> to vector<1x2x8xf32>
    tpu.vector_store %arg8[%c0_17, %c0_18, %c0_19], %21 {strides = array<i32>} : memref<4x2x8xf32, #tpu.memory_space<vmem>>, vector<1x2x8xf32>,
    %cst_20 = arith.constant dense<0xFF800000> : vector<2xf32>
    %22 = vector.multi_reduction <maximumf>, %18, %cst_20 [1] : vector<2x8xf32> to vector<2xf32>
    %23 = vector.shape_cast %22 : vector<2xf32> to vector<2x1xf32>
    %24 = tpu.iota {dimensions = array<i32: 1>} : vector<2x8xi32>
    %25 = vector.broadcast %23 : vector<2x1xf32> to vector<2x8xf32>
    %26 = arith.cmpf oge, %18, %25 : vector<2x8xf32>
    %c8_i32 = arith.constant 8 : i32
    %27 = vector.broadcast %c8_i32 : i32 to vector<2x8xi32>
    %28 = arith.select %26, %24, %27 : vector<2x8xi1>, vector<2x8xi32>
    %cst_21 = arith.constant dense<2147483647> : vector<2xi32>
    %29 = vector.multi_reduction <minsi>, %28, %cst_21 [1] : vector<2x8xi32> to vector<2xi32>
    %30 = vector.shape_cast %29 : vector<2xi32> to vector<2x1xi32>
    %31 = vector.broadcast %30 : vector<2x1xi32> to vector<2x8xi32>
    %32 = arith.cmpi eq, %24, %31 : vector<2x8xi32>
    %33 = arith.extui %32 : vector<2x8xi1> to vector<2x8xi32>
    %34 = arith.sitofp %33 : vector<2x8xi32> to vector<2x8xf32>
    %cst_22 = arith.constant dense<0.000000e+00> : vector<2x16xf32>
    %35 = tpu.matmul %34, %16, %cst_22 {dimension_numbers = #tpu.dot_dimension_numbers<[1], [0], [0], [1], [0, 0, 1, 1], [], []>} : vector<2x8xf32>, vector<8x16xf32>, vector<2x16xf32> -> vector<2x16xf32>
    %cst_23 = arith.constant dense<0.000000e+00> : vector<2x8xf32>
    %36 = tpu.matmul %35, %16, %cst_23 {dimension_numbers = #tpu.dot_dimension_numbers<[1], [1], [0], [0], [0, 0, 1, 0], [], []>} : vector<2x16xf32>, vector<8x16xf32>, vector<2x8xf32> -> vector<2x8xf32>
    %37 = vector.broadcast %14 : f32 to vector<2x8xf32>
    %38 = arith.mulf %36, %37 : vector<2x8xf32>
    %cst_24 = arith.constant dense<0xFF800000> : vector<2xf32>
    %39 = vector.multi_reduction <maximumf>, %38, %cst_24 [1] : vector<2x8xf32> to vector<2xf32>
    %40 = vector.shape_cast %39 : vector<2xf32> to vector<2x1xf32>
    %41 = vector.broadcast %40 : vector<2x1xf32> to vector<2x8xf32>
    %42 = arith.subf %38, %41 : vector<2x8xf32>
    %43 = math.exp %42 : vector<2x8xf32>
    %cst_25 = arith.constant dense<0.000000e+00> : vector<2xf32>
    %44 = vector.multi_reduction <add>, %43, %cst_25 [1] : vector<2x8xf32> to vector<2xf32>
    %45 = vector.shape_cast %44 : vector<2xf32> to vector<2x1xf32>
    %46 = vector.broadcast %45 : vector<2x1xf32> to vector<2x8xf32>
    %47 = arith.divf %43, %46 : vector<2x8xf32>
    %c0_26 = arith.constant 0 : index
    %c0_27 = arith.constant 0 : index
    %c0_28 = arith.constant 0 : index
    %48 = vector.load %arg10[%c0_26, %c0_27, %c0_28] : memref<4x2x8xf32, #tpu.memory_space<vmem>>, vector<1x2x8xf32>
    %49 = vector.shape_cast %48 : vector<1x2x8xf32> to vector<2x8xf32>
    %50 = vector.shape_cast %47 : vector<2x8xf32> to vector<1x2x8xf32>
    tpu.vector_store %arg10[%c0_26, %c0_27, %c0_28], %50 {strides = array<i32>} : memref<4x2x8xf32, #tpu.memory_space<vmem>>, vector<1x2x8xf32>,
    %51 = arith.truncf %47 : vector<2x8xf32> to vector<2x8xbf16>
    %cst_29 = arith.constant dense<0.000000e+00> : vector<2x32xf32>
    %52 = tpu.matmul %51, %17, %cst_29 {dimension_numbers = #tpu.dot_dimension_numbers<[1], [0], [0], [1], [0, 0, 1, 1], [], []>} : vector<2x8xbf16>, vector<8x32xbf16>, vector<2x32xf32> -> vector<2x32xf32>
    %c0_30 = arith.constant 0 : index
    %c0_31 = arith.constant 0 : index
    %c0_32 = arith.constant 0 : index
    %c0_33 = arith.constant 0 : index
    %53 = vector.load %arg11[%c0_30, %c0_31, %c0_32, %c0_33] : memref<4x1x2x32xf32, #tpu.memory_space<vmem>>, vector<1x1x2x32xf32>
    %54 = vector.shape_cast %53 : vector<1x1x2x32xf32> to vector<2x32xf32>
    %55 = vector.shape_cast %52 : vector<2x32xf32> to vector<1x1x2x32xf32>
    tpu.vector_store %arg11[%c0_30, %c0_31, %c0_32, %c0_33], %55 {strides = array<i32>} : memref<4x1x2x32xf32, #tpu.memory_space<vmem>>, vector<1x1x2x32xf32>,
    %56 = vector.shape_cast %52 : vector<2x32xf32> to vector<1x2x32xf32>
    %57 = vector.broadcast %56 : vector<1x2x32xf32> to vector<2x2x32xf32>
    %58 = arith.mulf %5, %57 : vector<2x2x32xf32>
    %cst_34 = arith.constant dense<0.000000e+00> : vector<2x2xf32>
    %59 = vector.multi_reduction <add>, %58, %cst_34 [2] : vector<2x2x32xf32> to vector<2x2xf32>
    %cst_35 = arith.constant dense<0.000000e+00> : vector<2xf32>
    %60 = vector.multi_reduction <add>, %59, %cst_35 [1] : vector<2x2xf32> to vector<2xf32>
    %61 = vector.shape_cast %60 : vector<2xf32> to vector<2x1xf32>
    %62 = arith.addf %61, %6 : vector<2x1xf32>
    %c0_36 = arith.constant 0 : index
    %c0_37 = arith.constant 0 : index
    %c0_38 = arith.constant 0 : index
    %63 = vector.load %arg9[%c0_36, %c0_37, %c0_38] : memref<4x2x1xf32, #tpu.memory_space<vmem>>, vector<1x2x1xf32>
    %64 = vector.shape_cast %63 : vector<1x2x1xf32> to vector<2x1xf32>
    %65 = vector.shape_cast %62 : vector<2x1xf32> to vector<1x2x1xf32>
    tpu.vector_store %arg9[%c0_36, %c0_37, %c0_38], %65 {strides = array<i32>} : memref<4x2x1xf32, #tpu.memory_space<vmem>>, vector<1x2x1xf32>,
    %66 = vector.extract_strided_slice %9 {offsets = [8, 0], sizes = [8, 2], strides = [1, 1]} : vector<32x2xf32> to vector<8x2xf32>
    %67 = vector.extract_strided_slice %12 {offsets = [8, 0], sizes = [8, 16], strides = [1, 1]} : vector<32x16xf32> to vector<8x16xf32>
    %68 = vector.extract_strided_slice %0 {offsets = [8, 0], sizes = [8, 32], strides = [1, 1]} : vector<32x32xbf16> to vector<8x32xbf16>
    %69 = tpu.transpose %66, [1, 0] : vector<8x2xf32> -> vector<2x8xf32>
    %c1 = arith.constant 1 : index
    %c0_39 = arith.constant 0 : index
    %c0_40 = arith.constant 0 : index
    %70 = vector.load %arg8[%c1, %c0_39, %c0_40] : memref<4x2x8xf32, #tpu.memory_space<vmem>>, vector<1x2x8xf32>
    %71 = vector.shape_cast %70 : vector<1x2x8xf32> to vector<2x8xf32>
    %72 = vector.shape_cast %69 : vector<2x8xf32> to vector<1x2x8xf32>
    tpu.vector_store %arg8[%c1, %c0_39, %c0_40], %72 {strides = array<i32>} : memref<4x2x8xf32, #tpu.memory_space<vmem>>, vector<1x2x8xf32>,
    %cst_41 = arith.constant dense<0xFF800000> : vector<2xf32>
    %73 = vector.multi_reduction <maximumf>, %69, %cst_41 [1] : vector<2x8xf32> to vector<2xf32>
    %74 = vector.shape_cast %73 : vector<2xf32> to vector<2x1xf32>
    %75 = tpu.iota {dimensions = array<i32: 1>} : vector<2x8xi32>
    %76 = vector.broadcast %74 : vector<2x1xf32> to vector<2x8xf32>
    %77 = arith.cmpf oge, %69, %76 : vector<2x8xf32>
    %c8_i32_42 = arith.constant 8 : i32
    %78 = vector.broadcast %c8_i32_42 : i32 to vector<2x8xi32>
    %79 = arith.select %77, %75, %78 : vector<2x8xi1>, vector<2x8xi32>
    %cst_43 = arith.constant dense<2147483647> : vector<2xi32>
    %80 = vector.multi_reduction <minsi>, %79, %cst_43 [1] : vector<2x8xi32> to vector<2xi32>
    %81 = vector.shape_cast %80 : vector<2xi32> to vector<2x1xi32>
    %82 = vector.broadcast %81 : vector<2x1xi32> to vector<2x8xi32>
    %83 = arith.cmpi eq, %75, %82 : vector<2x8xi32>
    %84 = arith.extui %83 : vector<2x8xi1> to vector<2x8xi32>
    %85 = arith.sitofp %84 : vector<2x8xi32> to vector<2x8xf32>
    %cst_44 = arith.constant dense<0.000000e+00> : vector<2x16xf32>
    %86 = tpu.matmul %85, %67, %cst_44 {dimension_numbers = #tpu.dot_dimension_numbers<[1], [0], [0], [1], [0, 0, 1, 1], [], []>} : vector<2x8xf32>, vector<8x16xf32>, vector<2x16xf32> -> vector<2x16xf32>
    %cst_45 = arith.constant dense<0.000000e+00> : vector<2x8xf32>
    %87 = tpu.matmul %86, %67, %cst_45 {dimension_numbers = #tpu.dot_dimension_numbers<[1], [1], [0], [0], [0, 0, 1, 0], [], []>} : vector<2x16xf32>, vector<8x16xf32>, vector<2x8xf32> -> vector<2x8xf32>
    %88 = vector.broadcast %14 : f32 to vector<2x8xf32>
    %89 = arith.mulf %87, %88 : vector<2x8xf32>
    %cst_46 = arith.constant dense<0xFF800000> : vector<2xf32>
    %90 = vector.multi_reduction <maximumf>, %89, %cst_46 [1] : vector<2x8xf32> to vector<2xf32>
    %91 = vector.shape_cast %90 : vector<2xf32> to vector<2x1xf32>
    %92 = vector.broadcast %91 : vector<2x1xf32> to vector<2x8xf32>
    %93 = arith.subf %89, %92 : vector<2x8xf32>
    %94 = math.exp %93 : vector<2x8xf32>
    %cst_47 = arith.constant dense<0.000000e+00> : vector<2xf32>
    %95 = vector.multi_reduction <add>, %94, %cst_47 [1] : vector<2x8xf32> to vector<2xf32>
    %96 = vector.shape_cast %95 : vector<2xf32> to vector<2x1xf32>
    %97 = vector.broadcast %96 : vector<2x1xf32> to vector<2x8xf32>
    %98 = arith.divf %94, %97 : vector<2x8xf32>
    %c1_48 = arith.constant 1 : index
    %c0_49 = arith.constant 0 : index
    %c0_50 = arith.constant 0 : index
    %99 = vector.load %arg10[%c1_48, %c0_49, %c0_50] : memref<4x2x8xf32, #tpu.memory_space<vmem>>, vector<1x2x8xf32>
    %100 = vector.shape_cast %99 : vector<1x2x8xf32> to vector<2x8xf32>
    %101 = vector.shape_cast %98 : vector<2x8xf32> to vector<1x2x8xf32>
    tpu.vector_store %arg10[%c1_48, %c0_49, %c0_50], %101 {strides = array<i32>} : memref<4x2x8xf32, #tpu.memory_space<vmem>>, vector<1x2x8xf32>,
    %102 = arith.truncf %98 : vector<2x8xf32> to vector<2x8xbf16>
    %cst_51 = arith.constant dense<0.000000e+00> : vector<2x32xf32>
    %103 = tpu.matmul %102, %68, %cst_51 {dimension_numbers = #tpu.dot_dimension_numbers<[1], [0], [0], [1], [0, 0, 1, 1], [], []>} : vector<2x8xbf16>, vector<8x32xbf16>, vector<2x32xf32> -> vector<2x32xf32>
    %c1_52 = arith.constant 1 : index
    %c0_53 = arith.constant 0 : index
    %c0_54 = arith.constant 0 : index
    %c0_55 = arith.constant 0 : index
    %104 = vector.load %arg11[%c1_52, %c0_53, %c0_54, %c0_55] : memref<4x1x2x32xf32, #tpu.memory_space<vmem>>, vector<1x1x2x32xf32>
    %105 = vector.shape_cast %104 : vector<1x1x2x32xf32> to vector<2x32xf32>
    %106 = vector.shape_cast %103 : vector<2x32xf32> to vector<1x1x2x32xf32>
    tpu.vector_store %arg11[%c1_52, %c0_53, %c0_54, %c0_55], %106 {strides = array<i32>} : memref<4x1x2x32xf32, #tpu.memory_space<vmem>>, vector<1x1x2x32xf32>,
    %107 = vector.shape_cast %103 : vector<2x32xf32> to vector<1x2x32xf32>
    %108 = vector.broadcast %107 : vector<1x2x32xf32> to vector<2x2x32xf32>
    %109 = arith.mulf %5, %108 : vector<2x2x32xf32>
    %cst_56 = arith.constant dense<0.000000e+00> : vector<2x2xf32>
    %110 = vector.multi_reduction <add>, %109, %cst_56 [2] : vector<2x2x32xf32> to vector<2x2xf32>
    %cst_57 = arith.constant dense<0.000000e+00> : vector<2xf32>
    %111 = vector.multi_reduction <add>, %110, %cst_57 [1] : vector<2x2xf32> to vector<2xf32>
    %112 = vector.shape_cast %111 : vector<2xf32> to vector<2x1xf32>
    %113 = arith.addf %112, %6 : vector<2x1xf32>
    %c1_58 = arith.constant 1 : index
    %c0_59 = arith.constant 0 : index
    %c0_60 = arith.constant 0 : index
    %114 = vector.load %arg9[%c1_58, %c0_59, %c0_60] : memref<4x2x1xf32, #tpu.memory_space<vmem>>, vector<1x2x1xf32>
    %115 = vector.shape_cast %114 : vector<1x2x1xf32> to vector<2x1xf32>
    %116 = vector.shape_cast %113 : vector<2x1xf32> to vector<1x2x1xf32>
    tpu.vector_store %arg9[%c1_58, %c0_59, %c0_60], %116 {strides = array<i32>} : memref<4x2x1xf32, #tpu.memory_space<vmem>>, vector<1x2x1xf32>,
    %117 = vector.extract_strided_slice %9 {offsets = [16, 0], sizes = [8, 2], strides = [1, 1]} : vector<32x2xf32> to vector<8x2xf32>
    %118 = vector.extract_strided_slice %12 {offsets = [16, 0], sizes = [8, 16], strides = [1, 1]} : vector<32x16xf32> to vector<8x16xf32>
    %119 = vector.extract_strided_slice %0 {offsets = [16, 0], sizes = [8, 32], strides = [1, 1]} : vector<32x32xbf16> to vector<8x32xbf16>
    %120 = tpu.transpose %117, [1, 0] : vector<8x2xf32> -> vector<2x8xf32>
    %c2 = arith.constant 2 : index
    %c0_61 = arith.constant 0 : index
    %c0_62 = arith.constant 0 : index
    %121 = vector.load %arg8[%c2, %c0_61, %c0_62] : memref<4x2x8xf32, #tpu.memory_space<vmem>>, vector<1x2x8xf32>
    %122 = vector.shape_cast %121 : vector<1x2x8xf32> to vector<2x8xf32>
    %123 = vector.shape_cast %120 : vector<2x8xf32> to vector<1x2x8xf32>
    tpu.vector_store %arg8[%c2, %c0_61, %c0_62], %123 {strides = array<i32>} : memref<4x2x8xf32, #tpu.memory_space<vmem>>, vector<1x2x8xf32>,
    %cst_63 = arith.constant dense<0xFF800000> : vector<2xf32>
    %124 = vector.multi_reduction <maximumf>, %120, %cst_63 [1] : vector<2x8xf32> to vector<2xf32>
    %125 = vector.shape_cast %124 : vector<2xf32> to vector<2x1xf32>
    %126 = tpu.iota {dimensions = array<i32: 1>} : vector<2x8xi32>
    %127 = vector.broadcast %125 : vector<2x1xf32> to vector<2x8xf32>
    %128 = arith.cmpf oge, %120, %127 : vector<2x8xf32>
    %c8_i32_64 = arith.constant 8 : i32
    %129 = vector.broadcast %c8_i32_64 : i32 to vector<2x8xi32>
    %130 = arith.select %128, %126, %129 : vector<2x8xi1>, vector<2x8xi32>
    %cst_65 = arith.constant dense<2147483647> : vector<2xi32>
    %131 = vector.multi_reduction <minsi>, %130, %cst_65 [1] : vector<2x8xi32> to vector<2xi32>
    %132 = vector.shape_cast %131 : vector<2xi32> to vector<2x1xi32>
    %133 = vector.broadcast %132 : vector<2x1xi32> to vector<2x8xi32>
    %134 = arith.cmpi eq, %126, %133 : vector<2x8xi32>
    %135 = arith.extui %134 : vector<2x8xi1> to vector<2x8xi32>
    %136 = arith.sitofp %135 : vector<2x8xi32> to vector<2x8xf32>
    %cst_66 = arith.constant dense<0.000000e+00> : vector<2x16xf32>
    %137 = tpu.matmul %136, %118, %cst_66 {dimension_numbers = #tpu.dot_dimension_numbers<[1], [0], [0], [1], [0, 0, 1, 1], [], []>} : vector<2x8xf32>, vector<8x16xf32>, vector<2x16xf32> -> vector<2x16xf32>
    %cst_67 = arith.constant dense<0.000000e+00> : vector<2x8xf32>
    %138 = tpu.matmul %137, %118, %cst_67 {dimension_numbers = #tpu.dot_dimension_numbers<[1], [1], [0], [0], [0, 0, 1, 0], [], []>} : vector<2x16xf32>, vector<8x16xf32>, vector<2x8xf32> -> vector<2x8xf32>
    %139 = vector.broadcast %14 : f32 to vector<2x8xf32>
    %140 = arith.mulf %138, %139 : vector<2x8xf32>
    %cst_68 = arith.constant dense<0xFF800000> : vector<2xf32>
    %141 = vector.multi_reduction <maximumf>, %140, %cst_68 [1] : vector<2x8xf32> to vector<2xf32>
    %142 = vector.shape_cast %141 : vector<2xf32> to vector<2x1xf32>
    %143 = vector.broadcast %142 : vector<2x1xf32> to vector<2x8xf32>
    %144 = arith.subf %140, %143 : vector<2x8xf32>
    %145 = math.exp %144 : vector<2x8xf32>
    %cst_69 = arith.constant dense<0.000000e+00> : vector<2xf32>
    %146 = vector.multi_reduction <add>, %145, %cst_69 [1] : vector<2x8xf32> to vector<2xf32>
    %147 = vector.shape_cast %146 : vector<2xf32> to vector<2x1xf32>
    %148 = vector.broadcast %147 : vector<2x1xf32> to vector<2x8xf32>
    %149 = arith.divf %145, %148 : vector<2x8xf32>
    %c2_70 = arith.constant 2 : index
    %c0_71 = arith.constant 0 : index
    %c0_72 = arith.constant 0 : index
    %150 = vector.load %arg10[%c2_70, %c0_71, %c0_72] : memref<4x2x8xf32, #tpu.memory_space<vmem>>, vector<1x2x8xf32>
    %151 = vector.shape_cast %150 : vector<1x2x8xf32> to vector<2x8xf32>
    %152 = vector.shape_cast %149 : vector<2x8xf32> to vector<1x2x8xf32>
    tpu.vector_store %arg10[%c2_70, %c0_71, %c0_72], %152 {strides = array<i32>} : memref<4x2x8xf32, #tpu.memory_space<vmem>>, vector<1x2x8xf32>,
    %153 = arith.truncf %149 : vector<2x8xf32> to vector<2x8xbf16>
    %cst_73 = arith.constant dense<0.000000e+00> : vector<2x32xf32>
    %154 = tpu.matmul %153, %119, %cst_73 {dimension_numbers = #tpu.dot_dimension_numbers<[1], [0], [0], [1], [0, 0, 1, 1], [], []>} : vector<2x8xbf16>, vector<8x32xbf16>, vector<2x32xf32> -> vector<2x32xf32>
    %c2_74 = arith.constant 2 : index
    %c0_75 = arith.constant 0 : index
    %c0_76 = arith.constant 0 : index
    %c0_77 = arith.constant 0 : index
    %155 = vector.load %arg11[%c2_74, %c0_75, %c0_76, %c0_77] : memref<4x1x2x32xf32, #tpu.memory_space<vmem>>, vector<1x1x2x32xf32>
    %156 = vector.shape_cast %155 : vector<1x1x2x32xf32> to vector<2x32xf32>
    %157 = vector.shape_cast %154 : vector<2x32xf32> to vector<1x1x2x32xf32>
    tpu.vector_store %arg11[%c2_74, %c0_75, %c0_76, %c0_77], %157 {strides = array<i32>} : memref<4x1x2x32xf32, #tpu.memory_space<vmem>>, vector<1x1x2x32xf32>,
    %158 = vector.shape_cast %154 : vector<2x32xf32> to vector<1x2x32xf32>
    %159 = vector.broadcast %158 : vector<1x2x32xf32> to vector<2x2x32xf32>
    %160 = arith.mulf %5, %159 : vector<2x2x32xf32>
    %cst_78 = arith.constant dense<0.000000e+00> : vector<2x2xf32>
    %161 = vector.multi_reduction <add>, %160, %cst_78 [2] : vector<2x2x32xf32> to vector<2x2xf32>
    %cst_79 = arith.constant dense<0.000000e+00> : vector<2xf32>
    %162 = vector.multi_reduction <add>, %161, %cst_79 [1] : vector<2x2xf32> to vector<2xf32>
    %163 = vector.shape_cast %162 : vector<2xf32> to vector<2x1xf32>
    %164 = arith.addf %163, %6 : vector<2x1xf32>
    %c2_80 = arith.constant 2 : index
    %c0_81 = arith.constant 0 : index
    %c0_82 = arith.constant 0 : index
    %165 = vector.load %arg9[%c2_80, %c0_81, %c0_82] : memref<4x2x1xf32, #tpu.memory_space<vmem>>, vector<1x2x1xf32>
    %166 = vector.shape_cast %165 : vector<1x2x1xf32> to vector<2x1xf32>
    %167 = vector.shape_cast %164 : vector<2x1xf32> to vector<1x2x1xf32>
    tpu.vector_store %arg9[%c2_80, %c0_81, %c0_82], %167 {strides = array<i32>} : memref<4x2x1xf32, #tpu.memory_space<vmem>>, vector<1x2x1xf32>,
    %168 = vector.extract_strided_slice %9 {offsets = [24, 0], sizes = [8, 2], strides = [1, 1]} : vector<32x2xf32> to vector<8x2xf32>
    %169 = vector.extract_strided_slice %12 {offsets = [24, 0], sizes = [8, 16], strides = [1, 1]} : vector<32x16xf32> to vector<8x16xf32>
    %170 = vector.extract_strided_slice %0 {offsets = [24, 0], sizes = [8, 32], strides = [1, 1]} : vector<32x32xbf16> to vector<8x32xbf16>
    %171 = tpu.transpose %168, [1, 0] : vector<8x2xf32> -> vector<2x8xf32>
    %c3 = arith.constant 3 : index
    %c0_83 = arith.constant 0 : index
    %c0_84 = arith.constant 0 : index
    %172 = vector.load %arg8[%c3, %c0_83, %c0_84] : memref<4x2x8xf32, #tpu.memory_space<vmem>>, vector<1x2x8xf32>
    %173 = vector.shape_cast %172 : vector<1x2x8xf32> to vector<2x8xf32>
    %174 = vector.shape_cast %171 : vector<2x8xf32> to vector<1x2x8xf32>
    tpu.vector_store %arg8[%c3, %c0_83, %c0_84], %174 {strides = array<i32>} : memref<4x2x8xf32, #tpu.memory_space<vmem>>, vector<1x2x8xf32>,
    %cst_85 = arith.constant dense<0xFF800000> : vector<2xf32>
    %175 = vector.multi_reduction <maximumf>, %171, %cst_85 [1] : vector<2x8xf32> to vector<2xf32>
    %176 = vector.shape_cast %175 : vector<2xf32> to vector<2x1xf32>
    %177 = tpu.iota {dimensions = array<i32: 1>} : vector<2x8xi32>
    %178 = vector.broadcast %176 : vector<2x1xf32> to vector<2x8xf32>
    %179 = arith.cmpf oge, %171, %178 : vector<2x8xf32>
    %c8_i32_86 = arith.constant 8 : i32
    %180 = vector.broadcast %c8_i32_86 : i32 to vector<2x8xi32>
    %181 = arith.select %179, %177, %180 : vector<2x8xi1>, vector<2x8xi32>
    %cst_87 = arith.constant dense<2147483647> : vector<2xi32>
    %182 = vector.multi_reduction <minsi>, %181, %cst_87 [1] : vector<2x8xi32> to vector<2xi32>
    %183 = vector.shape_cast %182 : vector<2xi32> to vector<2x1xi32>
    %184 = vector.broadcast %183 : vector<2x1xi32> to vector<2x8xi32>
    %185 = arith.cmpi eq, %177, %184 : vector<2x8xi32>
    %186 = arith.extui %185 : vector<2x8xi1> to vector<2x8xi32>
    %187 = arith.sitofp %186 : vector<2x8xi32> to vector<2x8xf32>
    %cst_88 = arith.constant dense<0.000000e+00> : vector<2x16xf32>
    %188 = tpu.matmul %187, %169, %cst_88 {dimension_numbers = #tpu.dot_dimension_numbers<[1], [0], [0], [1], [0, 0, 1, 1], [], []>} : vector<2x8xf32>, vector<8x16xf32>, vector<2x16xf32> -> vector<2x16xf32>
    %cst_89 = arith.constant dense<0.000000e+00> : vector<2x8xf32>
    %189 = tpu.matmul %188, %169, %cst_89 {dimension_numbers = #tpu.dot_dimension_numbers<[1], [1], [0], [0], [0, 0, 1, 0], [], []>} : vector<2x16xf32>, vector<8x16xf32>, vector<2x8xf32> -> vector<2x8xf32>
    %190 = vector.broadcast %14 : f32 to vector<2x8xf32>
    %191 = arith.mulf %189, %190 : vector<2x8xf32>
    %cst_90 = arith.constant dense<0xFF800000> : vector<2xf32>
    %192 = vector.multi_reduction <maximumf>, %191, %cst_90 [1] : vector<2x8xf32> to vector<2xf32>
    %193 = vector.shape_cast %192 : vector<2xf32> to vector<2x1xf32>
    %194 = vector.broadcast %193 : vector<2x1xf32> to vector<2x8xf32>
    %195 = arith.subf %191, %194 : vector<2x8xf32>
    %196 = math.exp %195 : vector<2x8xf32>
    %cst_91 = arith.constant dense<0.000000e+00> : vector<2xf32>
    %197 = vector.multi_reduction <add>, %196, %cst_91 [1] : vector<2x8xf32> to vector<2xf32>
    %198 = vector.shape_cast %197 : vector<2xf32> to vector<2x1xf32>
    %199 = vector.broadcast %198 : vector<2x1xf32> to vector<2x8xf32>
    %200 = arith.divf %196, %199 : vector<2x8xf32>
    %c3_92 = arith.constant 3 : index
    %c0_93 = arith.constant 0 : index
    %c0_94 = arith.constant 0 : index
    %201 = vector.load %arg10[%c3_92, %c0_93, %c0_94] : memref<4x2x8xf32, #tpu.memory_space<vmem>>, vector<1x2x8xf32>
    %202 = vector.shape_cast %201 : vector<1x2x8xf32> to vector<2x8xf32>
    %203 = vector.shape_cast %200 : vector<2x8xf32> to vector<1x2x8xf32>
    tpu.vector_store %arg10[%c3_92, %c0_93, %c0_94], %203 {strides = array<i32>} : memref<4x2x8xf32, #tpu.memory_space<vmem>>, vector<1x2x8xf32>,
    %204 = arith.truncf %200 : vector<2x8xf32> to vector<2x8xbf16>
    %cst_95 = arith.constant dense<0.000000e+00> : vector<2x32xf32>
    %205 = tpu.matmul %204, %170, %cst_95 {dimension_numbers = #tpu.dot_dimension_numbers<[1], [0], [0], [1], [0, 0, 1, 1], [], []>} : vector<2x8xbf16>, vector<8x32xbf16>, vector<2x32xf32> -> vector<2x32xf32>
    %c3_96 = arith.constant 3 : index
    %c0_97 = arith.constant 0 : index
    %c0_98 = arith.constant 0 : index
    %c0_99 = arith.constant 0 : index
    %206 = vector.load %arg11[%c3_96, %c0_97, %c0_98, %c0_99] : memref<4x1x2x32xf32, #tpu.memory_space<vmem>>, vector<1x1x2x32xf32>
    %207 = vector.shape_cast %206 : vector<1x1x2x32xf32> to vector<2x32xf32>
    %208 = vector.shape_cast %205 : vector<2x32xf32> to vector<1x1x2x32xf32>
    tpu.vector_store %arg11[%c3_96, %c0_97, %c0_98, %c0_99], %208 {strides = array<i32>} : memref<4x1x2x32xf32, #tpu.memory_space<vmem>>, vector<1x1x2x32xf32>,
    %209 = vector.shape_cast %205 : vector<2x32xf32> to vector<1x2x32xf32>
    %210 = vector.broadcast %209 : vector<1x2x32xf32> to vector<2x2x32xf32>
    %211 = arith.mulf %5, %210 : vector<2x2x32xf32>
    %cst_100 = arith.constant dense<0.000000e+00> : vector<2x2xf32>
    %212 = vector.multi_reduction <add>, %211, %cst_100 [2] : vector<2x2x32xf32> to vector<2x2xf32>
    %cst_101 = arith.constant dense<0.000000e+00> : vector<2xf32>
    %213 = vector.multi_reduction <add>, %212, %cst_101 [1] : vector<2x2xf32> to vector<2xf32>
    %214 = vector.shape_cast %213 : vector<2xf32> to vector<2x1xf32>
    %215 = arith.addf %214, %6 : vector<2x1xf32>
    %c3_102 = arith.constant 3 : index
    %c0_103 = arith.constant 0 : index
    %c0_104 = arith.constant 0 : index
    %216 = vector.load %arg9[%c3_102, %c0_103, %c0_104] : memref<4x2x1xf32, #tpu.memory_space<vmem>>, vector<1x2x1xf32>
    %217 = vector.shape_cast %216 : vector<1x2x1xf32> to vector<2x1xf32>
    %218 = vector.shape_cast %215 : vector<2x1xf32> to vector<1x2x1xf32>
    tpu.vector_store %arg9[%c3_102, %c0_103, %c0_104], %218 {strides = array<i32>} : memref<4x2x1xf32, #tpu.memory_space<vmem>>, vector<1x2x1xf32>,
    return
  }
  func.func @transform_0(%arg0: i32) -> (i32, i32) {
    %c0_i32 = arith.constant 0 : i32
    %c0_i32_0 = arith.constant 0 : i32
    return %arg0, %c0_i32 : i32, i32
  }
  func.func @transform_1(%arg0: i32) -> (i32, i32) {
    %c0_i32 = arith.constant 0 : i32
    %c0_i32_0 = arith.constant 0 : i32
    %c0_i32_1 = arith.constant 0 : i32
    return %c0_i32, %c0_i32_0 : i32, i32
  }
  func.func @transform_2(%arg0: i32) -> (i32, i32) {
    %c0_i32 = arith.constant 0 : i32
    %c0_i32_0 = arith.constant 0 : i32
    %c0_i32_1 = arith.constant 0 : i32
    return %c0_i32, %c0_i32_0 : i32, i32
  }
  func.func @transform_3(%arg0: i32) -> (i32, i32) {
    %c0_i32 = arith.constant 0 : i32
    %c0_i32_0 = arith.constant 0 : i32
    %c0_i32_1 = arith.constant 0 : i32
    return %c0_i32, %c0_i32_0 : i32, i32
  }
  func.func @transform_4(%arg0: i32) -> (i32, i32) {
    %c0_i32 = arith.constant 0 : i32
    %c0_i32_0 = arith.constant 0 : i32
    %c0_i32_1 = arith.constant 0 : i32
    return %c0_i32, %c0_i32_0 : i32, i32
  }
  func.func @transform_5(%arg0: i32) -> (i32, i32, i32) {
    %c0_i32 = arith.constant 0 : i32
    %c0_i32_0 = arith.constant 0 : i32
    %c0_i32_1 = arith.constant 0 : i32
    %c0_i32_2 = arith.constant 0 : i32
    return %c0_i32, %c0_i32_0, %c0_i32_1 : i32, i32, i32
  }
  func.func @transform_6(%arg0: i32) -> (i32, i32) {
    %c0_i32 = arith.constant 0 : i32
    %c0_i32_0 = arith.constant 0 : i32
    %c0_i32_1 = arith.constant 0 : i32
    return %c0_i32, %c0_i32_0 : i32, i32
  }
  func.func @transform_7(%arg0: i32) -> (i32, i32, i32) {
    %c0_i32 = arith.constant 0 : i32
    %c0_i32_0 = arith.constant 0 : i32
    %c0_i32_1 = arith.constant 0 : i32
    return %arg0, %c0_i32, %c0_i32_0 : i32, i32, i32
  }
  func.func @transform_8(%arg0: i32) -> (i32, i32, i32) {
    %c0_i32 = arith.constant 0 : i32
    %c0_i32_0 = arith.constant 0 : i32
    %c0_i32_1 = arith.constant 0 : i32
    return %arg0, %c0_i32, %c0_i32_0 : i32, i32, i32
  }
  func.func @transform_9(%arg0: i32) -> (i32, i32, i32) {
    %c0_i32 = arith.constant 0 : i32
    %c0_i32_0 = arith.constant 0 : i32
    %c0_i32_1 = arith.constant 0 : i32
    return %arg0, %c0_i32, %c0_i32_0 : i32, i32, i32
  }
  func.func @transform_10(%arg0: i32) -> (i32, i32, i32, i32) {
    %c0_i32 = arith.constant 0 : i32
    %c0_i32_0 = arith.constant 0 : i32
    %c0_i32_1 = arith.constant 0 : i32
    %c0_i32_2 = arith.constant 0 : i32
    return %arg0, %c0_i32, %c0_i32_0, %c0_i32_1 : i32, i32, i32, i32
  }
}

</mosaic_0001>

<bundles_post_ra>
// kernel: batch_mil_net_forward.1
= control target key start
LH: loop header
LB: loop body
LE: loop exit
PB: predicated region body
PF: predicated region fallthrough
CT: control target
= control target key end

     0   :  { %s2186_s13 = smov 0   ;;  %s2419_s0 = inlined_call_operand.vmem [shape: bf16[64,32], index: 0, kind: input, shape index: {}]   ;;  %s2420_s1 = inlined_call_operand.vmem [shape: bf16[32,2], index: 1, kind: input, shape index: {}]   ;;  %s2421_s2 = inlined_call_operand.vmem [shape: f32[1,2], index: 2, kind: input, shape index: {}]   ;;  %s2422_s3 = inlined_call_operand.vmem [shape: bf16[32,16], index: 3, kind: input, shape index: {}]   ;;  %s2423_s4 = inlined_call_operand.vmem [shape: f32[1,16], index: 4, kind: input, shape index: {}]   ;;  %s2424_s5 = inlined_call_operand.vmem [shape: f32[2,2,32], index: 5, kind: input, shape index: {}]   ;;  %s2425_s6 = inlined_call_operand.vmem [shape: f32[2,1], index: 6, kind: input, shape index: {}]   ;;  %s2426_s7 = inlined_call_operand.vmem [shape: f32[8,2,8], index: 7, kind: output, shape index: {0}]   ;;  %s2427_s8 = inlined_call_operand.vmem [shape: f32[8,2,1], index: 8, kind: output, shape index: {1}]   ;;  %s2428_s9 = inlined_call_operand.vmem [shape: f32[8,2,8], index: 9, kind: output, shape index: {2}]   ;;  %s2429_s10 = inlined_call_operand.vmem [shape: f32[8,1,2,32], index: 10, kind: output, shape index: {3}]  }
   0x1 LB: > { %s1916_s14 = sadd.s32 4294967295, %s2127_s13   ;;  %p1920_p0 = scmp.ge.s32.totalorder %s2127_s13, 1  ;;  %s2127_s13 = sphi %s2186_s13, %s21_s13  }
   0x2   : > { %p320_p1 = scmp.lt.s32.totalorder %s2127_s13, 3 }
   0x4   : > { %p321_p2 = pnand %p1920_p0, %p320_p1 }
   0x5   : > { %v2099_v0 = vld [vmem:[%s2420_s1] sm:$0xff] (!%p321_p2)   ;;  %s1921_s17 = sshll.u32 (!%p321_p2), %s1916_s14, 2  ;;  %v2100_v1 = vld [vmem:[%s2420_s1 + $0x8] sm:$0xff] (!%p321_p2)   ;;  %vm449_vm0 = vcmask (!%p321_p2), 261120   ;;  %vm604_vm1 = vcmask (!%p321_p2), 58368   ;;  %v609_v21 = vlaneseq (!%p321_p2)  ;;  %v2129_v28 = vmov (!%p321_p2), 0.0  }
   0x6   : > { %324 = sbr.rel (%p321_p2) target bundleno = 3293 (0xcdd), region = 48  ;;  %p374_p3 = scmp.lt.s32.totalorder (!%p321_p2), %s1921_s17, 7  ;;  %2009 = vmatprep.subr.bf16.mxu0 (!%p321_p2), %v2099_v0  ;;  %v1931_v8 = vld [vmem:[%s2421_s2] ss:$0 sm:$0xff] (!%p321_p2)  ;;  %v2104_v20 = vld [vmem:[%s2422_s3 + $0x8] sm:$0xff] (!%p321_p2)   ;;  %vm2130_vm4 = vmmov (!%p321_p2), 0  }
   0x7   : > { %2010 = vmatpush3.bf16.msra.mxu0 (!%p321_p2), %v2099_v0  ;;  %v2103_v19 = vld [vmem:[%s2422_s3] sm:$0xff] (!%p321_p2)   ;;  %v2242_v22 = vand.u32 (!%p321_p2), 127, %v609_v21  ;;  %vm631_vm5 = vcmask (!%p321_p2), 64512   ;;  %vm705_vm7 = vcmask (!%p321_p2), 130048  }
   0x8   : > { %2011 = vmatprep.subr.bf16.mxu0 (!%p321_p2), %v2100_v1  ;;  %2017 = vmatprep.subr.bf16.mxu1 (!%p321_p2), %v2103_v19  ;;  %v2253_v34 = vld [vmem:[%s2423_s4] ss:$0 sm:$0xff] (!%p321_p2) }
   0x9   : > { %2018 = vmatpush3.bf16.msra.mxu1 (!%p321_p2), %v2103_v19 }
   0xa   : > { %2019 = vmatprep.subr.bf16.mxu1 (!%p321_p2), %v2104_v20 }
   0xb   : > { %2012 = vmatpush3.bf16.msra.mxu0 (!%p321_p2), %v2100_v1 }
   0xc   : > { %2035 = vmatprep.subr.bf16.mxu0 (!%p321_p2), %v2129_v28 }
   0xd   : > { %s2431_s17 = smov (!%p374_p3, %s1921_s17), 7  ;;  %2020 = vmatpush3.bf16.msra.mxu1 %v2104_v20 }
   0xe   : > { %s1922_s20 = sshll.u32 %s2431_s17, 2  ;;  %s2223_s26 = sshll.u32 %s2431_s17, 1  ;;  %2025 = vmatprep.subr.mxu1 %v2129_v28 }
   0xf   : > { %s377_s23 = scalar_lea.vmem %s2419_s0, %s1922_s20  ;;  %s2229_s29 = scalar_lea.vmem %s2426_s7, %s2223_s26 }
  0x10   : > { %v2203_v2 = vld [vmem:[%s377_s23] sm:$0xf]  ;;  %v2205_v3 = vld [vmem:[%s377_s23 + $0x4] sm:$0xf]  ;;  %v2207_v4 = vld [vmem:[%s377_s23 + $0x8] sm:$0xf]  ;;  %s2342_s19 = scalar_lea.vmem %s2428_s9, %s2223_s26  ;;  %s2375_s22 = scalar_lea.vmem %s2429_s10, %s2223_s26 }
  0x11   : > { %v1932_v5 = vcombine.low %v2203_v2, %v2205_v3  ;;  %v2211_v6 = vld [vmem:[%s377_s23 + $0xc] sm:$0xf]  ;;  %s389_s12 = scalar_lea.vmem %s2427_s8, %s2223_s26 }
  0x12   : > { %v1933_v7 = vcombine.low %v2207_v4, %v2211_v6 }
  0x13   : > { %2013 = vmatprep.mubr.msk.bf16.mxu0 %vm449_vm0, %v1932_v5  ;;  %2021 = vmatprep.mubr.msk.bf16.mxu1 %vm449_vm0, %v1932_v5 }
  0x14   : > { %2014 = vmatmul.mubr.msk.bf16.vlgmr.msra.gmra.mrb[0].mxu0 %vm449_vm0, %v1933_v7  ;;  %2022 = vmatmul.mubr.msk.bf16.vlgmr.msra.gmra.mrb[0].mxu1 %vm449_vm0, %v1933_v7 }
  0x15   : > { %2027 = vmatprep.mubr.msk.f32.mxu1 %vm2130_vm4, %v2129_v28  ;;  %2037 = vmatprep.mubr.msk.bf16.mxu0 %vm2130_vm4, %v2129_v28 }
  0xe7   : > { %v2015_v9 = vpop.f32.mrb[0].mxu0  ;;  %v2248_v33 = vpop.f32.mrb[0].mxu1 }
  0xe8   : > { %v499_v10 = vadd.f32 %v2015_v9, %v1931_v8  ;;  %v490_v11 = vpop.f32.mrb[1].mxu0  ;;  %v557_v35 = vpop.f32.mrb[1].mxu1  ;;  %v566_v19 = vadd.f32 %v2248_v33, %v2253_v34 }
  0xe9   : > { %v2016_v12 = vpop.f32.mrb[2].mxu0  ;;  %v491_v13 = vadd.f32 %v1931_v8, %v490_v11  ;;  %v558_v36 = vadd.f32 %v2253_v34, %v557_v35  ;;  %v2269_v45 = vpop.f32.mrb[2].mxu1 }
  0xea   : > { %v2221_v14 = vadd.f32 %v2016_v12, %v1931_v8  ;;  %v493_v15 = vpop.f32.mrb[3].mxu0  ;;  %v560_v46 = vpop.f32.mrb[3].mxu1 }
  0xeb   : > { %v494_v16 = vadd.f32 %v1931_v8, %v493_v15  ;;  %572 = vxpose.xlu0.b32.start.end [1/1] (short) (narrow) %v491_v13, 8  ;;  %2026 = vmatpush3.msra.mxu1 %v558_v36  ;;  %v561_v53 = vadd.f32 %v2253_v34, %v560_v46 }
  0xec   : > { %2030 = vmatprep.subr.mxu1 %v2129_v28 }
 0x16b   : > { %v588_v17 = vpop.trf.xlu0 }
 0x16c   : > { %605 = vst.msk [vmem:[%s2229_s29] sm:$0x3] %vm604_vm1, %v588_v17  ;;  %v606_v18 = vsel %vm604_vm1, %v588_v17, -inf }
 0x16d   : > { %607 = vmax.xlane.f32.xlu0 %v606_v18 }
 0x1fa   : > { %v608_v23 = vpop.xlane.xlu0 %607 }
 0x1fb   : > { %vm611_vm2 = vcmp.ge.f32.partialorder %v588_v17, %v608_v23 }
 0x1fc   : > { %v612_v24 = vsel %vm611_vm2, %v2242_v22, 8  ;;  %vm799_vm2 = vcmask 1043456  }
 0x1fd   : > { %v613_v25 = vsel %vm604_vm1, %v612_v24, 2147483647 }
 0x1fe   : > { %v615_v26 = vshra.s32 %v613_v25, 16  ;;  %v614_v29 = vand.u32 65535, %v613_v25 }
 0x200   : > { %v617_v27 = vcvt.s32.f32 %v615_v26  ;;  %v616_v31 = vcvt.s32.f32 %v614_v29 }
 0x202   : > { %618 = vmin.xlane.f32.xlu1 %v617_v27 }
 0x28f   : > { %v619_v30 = vpop.xlane.xlu1 %618 }
 0x290   : > { %vm620_vm3 = vcmp.eq.f32.partialorder %v617_v27, %v619_v30  ;;  %v625_v37 = vcvt.f32.s32 %v619_v30 }
 0x291   : > { %v621_v32 = vsel %vm620_vm3, %v616_v31, inf  ;;  %vm843_vm3 = vcmask 254976  }
 0x292   : > { %622 = vmin.xlane.f32.xlu1 %v621_v32  ;;  %v626_v39 = vshll.u32 %v625_v37, 16 }
 0x2c5   : > { %873 = vxpose.xlu1.b32.start.end [1/1] (short) (narrow) %v494_v16, 8 }
 0x2c9   : > { %1168 = vxpose.xlu1.b32.start.end [1/1] (short) (narrow) %v499_v10, 8 }
 0x31f   : > { %v623_v38 = vpop.xlane.xlu1 %622 }
 0x320   : > { %v624_v40 = vcvt.f32.s32 %v623_v38 }
 0x322   : > { %v627_v41 = vadd.s32 %v626_v39, %v624_v40 }
 0x324   : > { %vm628_vm6 = vcmp.eq.s32.totalorder %v2242_v22, %v627_v41 }
 0x325   : > { %v1943_v42 = vsel %vm628_vm6, 1.0, %v2129_v28 }
 0x326   : > { %2028 = vmatmul.mubr.msk.f32.vlgmr.msra.gmra.mrb[4].mxu1 %vm631_vm5, %v1943_v42  ;;  %v569_v42 = vadd.f32 %v2269_v45, %v2253_v34 }
 0x327   : > { %2032 = vmatprep.mubr.msk.f32.mxu1 %vm2130_vm4, %v2129_v28  ;;  %2031 = vmatpush3.xpose.msk.msra.mxu1 %vm705_vm7, %v558_v36 }
 0x328   : > { %2041 = vmatprep.subr.mxu1 %v2129_v28 }
 0x345   : > { %v889_v43 = vpop.trf.xlu1 }
 0x346   : > { %1948 = vst.msk [vmem:[%s2229_s29 + $0x2] sm:$0x3] %vm604_vm1, %v889_v43  ;;  %v907_v44 = vsel %vm604_vm1, %v889_v43, -inf }
 0x347   : > { %908 = vmax.xlane.f32.xlu0 %v907_v44 }
 0x349   : > { %v1184_v52 = vpop.trf.xlu1 }
 0x34a   : > { %1957 = vst.msk [vmem:[%s2229_s29 + $0x4] sm:$0x3] %vm604_vm1, %v1184_v52  ;;  %v1202_v60 = vsel %vm604_vm1, %v1184_v52, -inf }
 0x3d4   : > { %v909_v47 = vpop.xlane.xlu0 %908 }
 0x3d5   : > { %vm910_vm8 = vcmp.ge.f32.partialorder %v889_v43, %v909_v47 }
 0x3d6   : > { %v911_v48 = vsel %vm910_vm8, %v2242_v22, 8 }
 0x3d7   : > { %v912_v49 = vsel %vm604_vm1, %v911_v48, 2147483647 }
 0x3d8   : > { %v914_v50 = vshra.s32 %v912_v49, 16  ;;  %v913_v56 = vand.u32 65535, %v912_v49 }
 0x3da   : > { %v916_v51 = vcvt.s32.f32 %v914_v50  ;;  %v915_v58 = vcvt.s32.f32 %v913_v56 }
 0x3dc   : > { %917 = vmin.xlane.f32.xlu0 %v916_v51 }
 0x3f9   : > { %v701_v54 = vpop.f32.mrb[4].mxu1 }
 0x3fa   : > { %v2029_v55 = vpop.f32.mrb[5].mxu1  ;;  %2033 = vmatmul.mubr.msk.f32.vlgmr.msra.gmra.mrb[6].mxu1 %vm705_vm7, %v701_v54 }
 0x3fb   : > { %2042 = vmatpush3.msra.mxu1 %v561_v53  ;;  %2043 = vmatprep.mubr.msk.f32.mxu1 %vm2130_vm4, %v2129_v28 }
 0x3fc   : > { %2046 = vmatprep.subr.mxu1 %v2129_v28 }
 0x469   : > { %v918_v57 = vpop.xlane.xlu0 %917 }
 0x46a   : > { %vm919_vm9 = vcmp.eq.f32.partialorder %v916_v51, %v918_v57  ;;  %v924_v63 = vcvt.f32.s32 %v918_v57 }
 0x46b   : > { %v920_v59 = vsel %vm919_vm9, %v915_v58, inf }
 0x46c   : > { %921 = vmin.xlane.f32.xlu0 %v920_v59  ;;  %v925_v1 = vshll.u32 %v924_v63, 16 }
 0x470   : > { %1203 = vmax.xlane.f32.xlu0 %v1202_v60 }
 0x4cd   : > { %v778_v61 = vpop.f32.mrb[6].mxu1 }
 0x4ce   : > { %v2034_v62 = vpop.f32.mrb[7].mxu1  ;;  %v2299_v24 = vmul.f32 0.25, %v778_v61 }
 0x4d0   : > { %v783_v25 = vsel %vm604_vm1, %v2299_v24, -inf }
 0x4f9   : > { %v922_v0 = vpop.xlane.xlu0 %921 }
 0x4fa   : > { %v923_v5 = vcvt.f32.s32 %v922_v0 }
 0x4fc   : > { %v926_v7 = vadd.s32 %v925_v1, %v923_v5 }
 0x4fd   : > { %v1204_v8 = vpop.xlane.xlu0 %1203 }
 0x4fe   : > { %vm927_vm10 = vcmp.eq.s32.totalorder %v2242_v22, %v926_v7  ;;  %vm1205_vm11 = vcmp.ge.f32.partialorder %v1184_v52, %v1204_v8 }
 0x4ff   : > { %v1949_v9 = vsel %vm927_vm10, 1.0, %v2129_v28  ;;  %v1206_v10 = vsel %vm1205_vm11, %v2242_v22, 8 }
 0x500   : > { %v1207_v11 = vsel %vm604_vm1, %v1206_v10, 2147483647  ;;  %2044 = vmatmul.mubr.msk.f32.vlgmr.msra.gmra.mrb[8].mxu1 %vm631_vm5, %v1949_v9 }
 0x501   : > { %v1209_v12 = vshra.s32 %v1207_v11, 16  ;;  %2047 = vmatpush3.xpose.msk.msra.mxu1 %vm705_vm7, %v561_v53  ;;  %2048 = vmatprep.mubr.msk.f32.mxu1 %vm2130_vm4, %v2129_v28  ;;  %v1208_v15 = vand.u32 65535, %v1207_v11 }
 0x502   : > { %2057 = vmatprep.subr.mxu1 %v2129_v28 }
 0x503   : > { %v1211_v13 = vcvt.s32.f32 %v1209_v12  ;;  %v1210_v17 = vcvt.s32.f32 %v1208_v15 }
 0x505   : > { %1212 = vmin.xlane.f32.xlu1 %v1211_v13 }
 0x592   : > { %v1213_v16 = vpop.xlane.xlu1 %1212 }
 0x593   : > { %vm1214_vm12 = vcmp.eq.f32.partialorder %v1211_v13, %v1213_v16 }
 0x594   : > { %v1215_v18 = vsel %vm1214_vm12, %v1210_v17, inf }
 0x595   : > { %1216 = vmin.xlane.f32.xlu0 %v1215_v18 }
 0x5c2   : > { %1463 = vxpose.xlu0.b32.start.end [1/1] (short) (narrow) %v2221_v14, 8  ;;  %v1219_v14 = vcvt.f32.s32 %v1213_v16 }
 0x5c4   : > { %v1220_v27 = vshll.u32 %v1219_v14, 16 }
 0x5d3   : > { %v999_v20 = vpop.f32.mrb[8].mxu1 }
 0x5d4   : > { %v2045_v23 = vpop.f32.mrb[9].mxu1  ;;  %2049 = vmatmul.mubr.msk.f32.vlgmr.msra.gmra.mrb[10].mxu1 %vm705_vm7, %v999_v20 }
 0x5d5   : > { %2058 = vmatpush3.msra.mxu1 %v566_v19  ;;  %2059 = vmatprep.mubr.msk.f32.mxu1 %vm2130_vm4, %v2129_v28 }
 0x5d6   : > { %2062 = vmatprep.subr.mxu1 %v2129_v28 }
 0x5ef   : > { %784 = vmax.xlane.f32.xlu0 %v783_v25 }
 0x622   : > { %v1217_v26 = vpop.xlane.xlu0 %1216 }
 0x623   : > { %v1218_v29 = vcvt.f32.s32 %v1217_v26 }
 0x625   : > { %v1221_v30 = vadd.s32 %v1220_v27, %v1218_v29 }
 0x627   : > { %vm1222_vm13 = vcmp.eq.s32.totalorder %v2242_v22, %v1221_v30 }
 0x628   : > { %v1958_v31 = vsel %vm1222_vm13, 1.0, %v2129_v28 }
 0x629   : > { %2060 = vmatmul.mubr.msk.f32.vlgmr.msra.gmra.mrb[12].mxu1 %vm631_vm5, %v1958_v31 }
 0x62a   : > { %2063 = vmatpush3.xpose.msk.msra.mxu1 %vm705_vm7, %v566_v19  ;;  %2064 = vmatprep.mubr.msk.f32.mxu1 %vm2130_vm4, %v2129_v28 }
 0x62b   : > { %2073 = vmatprep.subr.mxu1 %v2129_v28 }
 0x642   : > { %v1479_v32 = vpop.trf.xlu0 }
 0x643   : > { %1966 = vst.msk [vmem:[%s2229_s29 + $0x6] sm:$0x3] %vm604_vm1, %v1479_v32  ;;  %v1497_v33 = vsel %vm604_vm1, %v1479_v32, -inf }
 0x644   : > { %1498 = vmax.xlane.f32.xlu1 %v1497_v33 }
 0x67c   : > { %v785_v62 = vpop.xlane.xlu0 %784 }
 0x67d   : > { %v786_v63 = vsub.f32 %v2299_v24, %v785_v62  ;;  %v801_v24 = vsel %vm799_vm2, %v2203_v2, 0 }
 0x67e   : > { %2036 = vmatpush3.bf16.msra.mxu0 %v801_v24 }
 0x67f   : > { %v787_v1 = vmul.f32 1.442695, %v786_v63  ;;  %2051 = vmatprep.subr.bf16.mxu0 %v2129_v28 }
 0x681   : > { %2105 = vpow2.f32 %v787_v1 }
 0x68b   : > { %v2106_v16 = vpop.eup %2105 }
 0x68c   : > { %v789_v17 = vsel %vm604_vm1, %v2106_v16, 0.0 }
 0x6a7   : > { %v1075_v35 = vpop.f32.mrb[10].mxu1 }
 0x6a8   : > { %v2050_v36 = vpop.f32.mrb[11].mxu1  ;;  %v1079_v49 = vmul.f32 0.25, %v1075_v35 }
 0x6aa   : > { %v1080_v51 = vsel %vm604_vm1, %v1079_v49, -inf }
 0x6d1   : > { %v1499_v37 = vpop.xlane.xlu1 %1498 }
 0x6d2   : > { %vm1500_vm14 = vcmp.ge.f32.partialorder %v1479_v32, %v1499_v37  ;;  %v1098_v37 = vsel %vm799_vm2, %v2205_v3, 0  ;;  %v1393_v3 = vsel %vm799_vm2, %v2207_v4, 0 }
 0x6d3   : > { %v1501_v38 = vsel %vm1500_vm14, %v2242_v22, 8 }
 0x6d4   : > { %v1502_v39 = vsel %vm604_vm1, %v1501_v38, 2147483647 }
 0x6d5   : > { %v1504_v40 = vshra.s32 %v1502_v39, 16  ;;  %v1503_v46 = vand.u32 65535, %v1502_v39 }
 0x6d7   : > { %v1506_v41 = vcvt.s32.f32 %v1504_v40  ;;  %v1505_v48 = vcvt.s32.f32 %v1503_v46 }
 0x6d9   : > { %1507 = vmin.xlane.f32.xlu1 %v1506_v41 }
 0x6fc   : > { %v1294_v43 = vpop.f32.mrb[12].mxu1 }
 0x6fd   : > { %v2061_v44 = vpop.f32.mrb[13].mxu1  ;;  %2065 = vmatmul.mubr.msk.f32.vlgmr.msra.gmra.mrb[14].mxu1 %vm705_vm7, %v1294_v43  ;;  %v1688_v43 = vsel %vm799_vm2, %v2211_v6, 0  ;;  %v418_v6 = vld [vmem:[%s2424_s5] sm:$0x3] }
 0x6fe   : > { %2074 = vmatpush3.msra.mxu1 %v569_v42  ;;  %2075 = vmatprep.mubr.msk.f32.mxu1 %vm2130_vm4, %v2129_v28 }
 0x6ff   : > { %2078 = vmatprep.subr.mxu1 %v2129_v28 }
 0x766   : > { %v1508_v47 = vpop.xlane.xlu1 %1507 }
 0x767   : > { %vm1509_vm15 = vcmp.eq.f32.partialorder %v1506_v41, %v1508_v47  ;;  %v1514_v54 = vcvt.f32.s32 %v1508_v47 }
 0x768   : > { %v1510_v50 = vsel %vm1509_vm15, %v1505_v48, inf  ;;  %v419_v48 = vld [vmem:[%s2424_s5 + $0x2] sm:$0x3] }
 0x769   : > { %1511 = vmin.xlane.f32.xlu1 %v1510_v50  ;;  %v1515_v56 = vshll.u32 %v1514_v54, 16 }
 0x76d   : > { %1081 = vmax.xlane.f32.xlu1 %v1080_v51 }
 0x7d0   : > { %v1370_v34 = vpop.f32.mrb[14].mxu1 }
 0x7d1   : > { %v1374_v45 = vmul.f32 0.25, %v1370_v34  ;;  %v2066_v52 = vpop.f32.mrb[15].mxu1 }
 0x7d3   : > { %v1375_v53 = vsel %vm604_vm1, %v1374_v45, -inf }
 0x7d4   : > { %1376 = vmax.xlane.f32.xlu1 %v1375_v53 }
 0x7f6   : > { %v1512_v55 = vpop.xlane.xlu1 %1511 }
 0x7f7   : > { %v1513_v57 = vcvt.f32.s32 %v1512_v55 }
 0x7f9   : > { %v1516_v58 = vadd.s32 %v1515_v56, %v1513_v57 }
 0x7fa   : > { %v1082_v0 = vpop.xlane.xlu1 %1081 }
 0x7fb   : > { %vm1517_vm0 = vcmp.eq.s32.totalorder %v2242_v22, %v1516_v58  ;;  %v1083_v5 = vsub.f32 %v1079_v49, %v1082_v0 }
 0x7fc   : > { %v1967_v59 = vsel %vm1517_vm0, 1.0, %v2129_v28 }
 0x7fd   : > { %2076 = vmatmul.mubr.msk.f32.vlgmr.msra.gmra.mrb[16].mxu1 %vm631_vm5, %v1967_v59  ;;  %v1084_v8 = vmul.f32 1.442695, %v1083_v5 }
 0x7fe   : > { %2079 = vmatpush3.xpose.msk.msra.mxu1 %vm705_vm7, %v569_v42  ;;  %2080 = vmatprep.mubr.msk.f32.mxu1 %vm2130_vm4, %v2129_v28 }
 0x7ff   : > { %2107 = vpow2.f32 %v1084_v8 }
 0x809   : > { %v2108_v18 = vpop.eup %2107 }
 0x80a   : > { %v1086_v19 = vsel %vm604_vm1, %v2108_v18, 0.0 }
 0x861   : > { %v1377_v7 = vpop.xlane.xlu1 %1376 }
 0x862   : > { %v1378_v9 = vsub.f32 %v1374_v45, %v1377_v7 }
 0x864   : > { %v1379_v10 = vmul.f32 1.442695, %v1378_v9 }
 0x866   : > { %2109 = vpow2.f32 %v1379_v10 }
 0x870   : > { %v2110_v20 = vpop.eup %2109 }
 0x871   : > { %v1381_v23 = vsel %vm604_vm1, %v2110_v20, 0.0 }
 0x8d0   : > { %v1589_v60 = vpop.f32.mrb[16].mxu1 }
 0x8d1   : > { %v2077_v61 = vpop.f32.mrb[17].mxu1  ;;  %2081 = vmatmul.mubr.msk.f32.vlgmr.msra.gmra.mrb[18].mxu1 %vm705_vm7, %v1589_v60 }
 0x9a4   : > { %v1665_v11 = vpop.f32.mrb[18].mxu1 }
 0x9a5   : > { %v1669_v12 = vmul.f32 0.25, %v1665_v11  ;;  %v2082_v13 = vpop.f32.mrb[19].mxu1  ;;  %v856_v11 = vshrl.u32 %v609_v21, 7 }
 0x9a7   : > { %v1670_v15 = vsel %vm604_vm1, %v1669_v12, -inf  ;;  %v857_v13 = vsub.s32 %v2242_v22, %v856_v11 }
 0x9a8   : > { %1671 = vmax.xlane.f32.xlu1 %v1670_v15 }
 0x9ac   : > { %790 = vadd.xlane.f32.xlu1 %v789_v17 }
 0x9b0   : > { %1087 = vadd.xlane.f32.xlu1 %v1086_v19 }
 0x9b4   : > { %1382 = vadd.xlane.f32.xlu1 %v1381_v23 }
 0xa35   : > { %v1672_v25 = vpop.xlane.xlu1 %1671 }
 0xa36   : > { %v1673_v14 = vsub.f32 %v1669_v12, %v1672_v25 }
 0xa38   : > { %v1674_v26 = vmul.f32 1.442695, %v1673_v14 }
 0xa39   : > { %v791_v27 = vpop.xlane.xlu1 %790 }
 0xa3a   : > { %2111 = vpow2.f32 %v1674_v26 }
 0xa3b   : > { %2113 = vrcp.f32 %v791_v27 }
 0xa3d   : > { %v1088_v29 = vpop.xlane.xlu1 %1087 }
 0xa3e   : > { %2115 = vrcp.f32 %v1088_v29 }
 0xa41   : > { %v1383_v30 = vpop.xlane.xlu1 %1382 }
 0xa42   : > { %2117 = vrcp.f32 %v1383_v30 }
 0xa44   : > { %v2112_v31 = vpop.eup %2111 }
 0xa45   : > { %v2114_v32 = vpop.eup %2113  ;;  %v1676_v2 = vsel %vm604_vm1, %v2112_v31, 0.0 }
 0xa46   : > { %v793_v33 = vmul.f32 %v2114_v32, %v2106_v16  ;;  %1677 = vadd.xlane.f32.xlu1 %v1676_v2 }
 0xa48   : > { %v2116_v35 = vpop.eup %2115  ;;  %794 = vst.msk [vmem:[%s2342_s19] sm:$0x3] %vm604_vm1, %v793_v33  ;;  %v795_v36 = vpack.c.bf16 %v793_v33, %v793_v33 }
 0xa49   : > { %v1090_v38 = vmul.f32 %v2116_v35, %v2108_v18 }
 0xa4a   : > { %2038 = vmatmul.mubr.msk.bf16.vlgmr.msra.gmra.mrb[4].mxu0 %vm631_vm5, %v795_v36 }
 0xa4b   : > { %1953 = vst.msk [vmem:[%s2342_s19 + $0x2] sm:$0x3] %vm604_vm1, %v1090_v38  ;;  %2052 = vmatpush3.bf16.msra.mxu0 %v1098_v37  ;;  %2053 = vmatprep.mubr.msk.bf16.mxu0 %vm2130_vm4, %v2129_v28  ;;  %v1093_v41 = vpack.c.bf16 %v1090_v38, %v1090_v38 }
 0xa4c   : > { %v2118_v39 = vpop.eup %2117  ;;  %2067 = vmatprep.subr.bf16.mxu0 %v2129_v28 }
 0xa4d   : > { %v1385_v40 = vmul.f32 %v2118_v39, %v2110_v20 }
 0xa4f   : > { %1962 = vst.msk [vmem:[%s2342_s19 + $0x4] sm:$0x3] %vm604_vm1, %v1385_v40  ;;  %v1388_v42 = vpack.c.bf16 %v1385_v40, %v1385_v40 }
 0xa52   : > { %2054 = vmatmul.mubr.msk.bf16.vlgmr.msra.gmra.mrb[8].mxu0 %vm631_vm5, %v1093_v41 }
 0xa53   : > { %2068 = vmatpush3.bf16.msra.mxu0 %v1393_v3  ;;  %2069 = vmatprep.mubr.msk.bf16.mxu0 %vm2130_vm4, %v2129_v28 }
 0xa54   : > { %2083 = vmatprep.subr.bf16.mxu0 %v2129_v28 }
 0xa5a   : > { %2070 = vmatmul.mubr.msk.bf16.vlgmr.msra.gmra.mrb[12].mxu0 %vm631_vm5, %v1388_v42  ;;  %v420_v42 = vld [vmem:[%s2425_s6] sm:$0x3] }
 0xa5b   : > { %2085 = vmatprep.mubr.msk.bf16.mxu0 %vm2130_vm4, %v2129_v28  ;;  %2084 = vmatpush3.bf16.msra.mxu0 %v1688_v43  ;;  %vm866_vm4 = vcmask 9216  }
 0xad3   : > { %v1678_v4 = vpop.xlane.xlu1 %1677 }
 0xad4   : > { %2119 = vrcp.f32 %v1678_v4 }
 0xade   : > { %v2120_v44 = vpop.eup %2119 }
 0xadf   : > { %v1680_v46 = vmul.f32 %v2120_v44, %v2112_v31 }
 0xae1   : > { %1971 = vst.msk [vmem:[%s2342_s19 + $0x6] sm:$0x3] %vm604_vm1, %v1680_v46  ;;  %v1683_v47 = vpack.c.bf16 %v1680_v46, %v1680_v46  ;;  %vm863_vm1 = vcmask 1041409  }
 0xae3   : > { %2086 = vmatmul.mubr.msk.bf16.vlgmr.msra.gmra.mrb[16].mxu0 %vm631_vm5, %v1683_v47  ;;  %vm871_vm5 = vcmask 1024  }
 0xb1d   : > { %v837_v28 = vpop.f32.mrb[4].mxu0 }
 0xb1e   : > { %844 = vst.msk [vmem:[%s2375_s22] sm:$0x3] %vm843_vm3, %v837_v28  ;;  %v2039_v49 = vpop.f32.mrb[5].mxu0  ;;  %v845_v50 = vmul.f32 %v837_v28, %v418_v6  ;;  %v846_v52 = vmul.f32 %v837_v28, %v419_v48 }
 0xb1f   : > { %v840_v51 = vpop.f32.mrb[6].mxu0 }
 0xb20   : > { %v2040_v34 = vpop.f32.mrb[7].mxu0  ;;  %v847_v45 = vsel %vm843_vm3, %v845_v50, 0.0  ;;  %v850_v53 = vsel %vm843_vm3, %v846_v52, 0.0 }
 0xb21   : > { %848 = vadd.xlane.f32.xlu1 %v847_v45 }
 0xb25   : > { %851 = vadd.xlane.f32.xlu1 %v850_v53  ;;  %v1134_v54 = vpop.f32.mrb[8].mxu0 }
 0xb26   : > { %1955 = vst.msk [vmem:[%s2375_s22 + $0x2] sm:$0x3] %vm843_vm3, %v1134_v54  ;;  %v2055_v55 = vpop.f32.mrb[9].mxu0  ;;  %v1142_v56 = vmul.f32 %v1134_v54, %v418_v6  ;;  %v1143_v60 = vmul.f32 %v1134_v54, %v419_v48 }
 0xb27   : > { %v1137_v57 = vpop.f32.mrb[10].mxu0 }
 0xb28   : > { %v2056_v58 = vpop.f32.mrb[11].mxu0  ;;  %v1144_v59 = vsel %vm843_vm3, %v1142_v56, 0.0  ;;  %v1147_v61 = vsel %vm843_vm3, %v1143_v60, 0.0 }
 0xb29   : > { %1145 = vadd.xlane.f32.xlu1 %v1144_v59 }
 0xb2d   : > { %1148 = vadd.xlane.f32.xlu1 %v1147_v61  ;;  %v1429_v62 = vpop.f32.mrb[12].mxu0 }
 0xb2e   : > { %1964 = vst.msk [vmem:[%s2375_s22 + $0x4] sm:$0x3] %vm843_vm3, %v1429_v62  ;;  %v2071_v63 = vpop.f32.mrb[13].mxu0  ;;  %v1438_v0 = vmul.f32 %v1429_v62, %v419_v48  ;;  %v1437_v1 = vmul.f32 %v1429_v62, %v418_v6 }
 0xb2f   : > { %v1432_v5 = vpop.f32.mrb[14].mxu0 }
 0xb30   : > { %v2072_v7 = vpop.f32.mrb[15].mxu0  ;;  %v1442_v8 = vsel %vm843_vm3, %v1438_v0, 0.0  ;;  %v1439_v9 = vsel %vm843_vm3, %v1437_v1, 0.0 }
 0xb31   : > { %1443 = vadd.xlane.f32.xlu0 %v1442_v8  ;;  %1440 = vadd.xlane.f32.xlu1 %v1439_v9 }
 0xbae   : > { %v849_v10 = vpop.xlane.xlu1 %848 }
 0xbaf   : > { %v858_v23 = vrot.slane %v849_v10, %v857_v13 }
 0xbb2   : > { %v852_v12 = vpop.xlane.xlu1 %851 }
 0xbb3   : > { %v862_v15 = vrot.slane %v852_v12, %v857_v13 }
 0xbb5   : > { %v864_v22 = vsel %vm863_vm1, %v862_v15, %v858_v23 }
 0xbb6   : > { %v1146_v16 = vpop.xlane.xlu1 %1145  ;;  %v1724_v17 = vpop.f32.mrb[16].mxu0  ;;  %v867_v30 = vsel %vm866_vm4, %v864_v22, 0.0 }
 0xbb7   : > { %1973 = vst.msk [vmem:[%s2375_s22 + $0x6] sm:$0x3] %vm843_vm3, %v1724_v17  ;;  %v2087_v18 = vpop.f32.mrb[17].mxu0  ;;  %v1733_v19 = vmul.f32 %v1724_v17, %v419_v48  ;;  %v1732_v20 = vmul.f32 %v1724_v17, %v418_v6  ;;  %v1155_v27 = vrot.slane %v1146_v16, %v857_v13 }
 0xbb8   : > { %v1727_v24 = vpop.f32.mrb[18].mxu0 }
 0xbb9   : > { %v2088_v25 = vpop.f32.mrb[19].mxu0  ;;  %v1737_v14 = vsel %vm843_vm3, %v1733_v19, 0.0  ;;  %v1734_v26 = vsel %vm843_vm3, %v1732_v20, 0.0 }
 0xbba   : > { %v1149_v21 = vpop.xlane.xlu1 %1148  ;;  %1738 = vadd.xlane.f32.xlu0 %v1737_v14  ;;  %1735 = vadd.xlane.f32.xlu1 %v1734_v26 }
 0xbbb   : > { %v1159_v29 = vrot.slane %v1149_v21, %v857_v13 }
 0xbbd   : > { %v1160_v31 = vsel %vm863_vm1, %v1159_v29, %v1155_v27 }
 0xbbe   : > { %v1444_v32 = vpop.xlane.xlu0 %1443  ;;  %v1441_v2 = vpop.xlane.xlu1 %1440  ;;  %868 = vadd.xlane.f32.xlu1 %v867_v30  ;;  %v1162_v33 = vsel %vm866_vm4, %v1160_v31, 0.0 }
 0xbbf   : > { %v1454_v35 = vrot.slane %v1444_v32, %v857_v13  ;;  %v1450_v36 = vrot.slane %v1441_v2, %v857_v13  ;;  %1163 = vadd.xlane.f32.xlu0 %v1162_v33 }
 0xbc1   : > { %v1455_v37 = vsel %vm863_vm1, %v1454_v35, %v1450_v36 }
 0xbc2   : > { %v1457_v38 = vsel %vm866_vm4, %v1455_v37, 0.0 }
 0xbc3   : > { %1458 = vadd.xlane.f32.xlu1 %v1457_v38 }
 0xc47   : > { %v1739_v39 = vpop.xlane.xlu0 %1738  ;;  %v1736_v40 = vpop.xlane.xlu1 %1735 }
 0xc48   : > { %v1749_v41 = vrot.slane %v1739_v39, %v857_v13  ;;  %v1745_v3 = vrot.slane %v1736_v40, %v857_v13 }
 0xc4a   : > { %v1750_v43 = vsel %vm863_vm1, %v1749_v41, %v1745_v3 }
 0xc4b   : > { %v869_v4 = vpop.xlane.xlu1 %868  ;;  %v1752_v44 = vsel %vm866_vm4, %v1750_v43, 0.0 }
 0xc4c   : > { %v1164_v46 = vpop.xlane.xlu0 %1163  ;;  %v870_v47 = vadd.f32 %v869_v4, %v420_v42  ;;  %1753 = vadd.xlane.f32.xlu0 %v1752_v44 }
 0xc4d   : > { %v1165_v6 = vadd.f32 %v1164_v46, %v420_v42 }
 0xc4e   : > { %872 = vst.msk [vmem:[%s389_s12] sm:$0x3] %vm871_vm5, %v870_v47 }
 0xc4f   : > { %1956 = vst.msk [vmem:[%s389_s12 + $0x2] sm:$0x3] %vm871_vm5, %v1165_v6 }
 0xc50   : > { %v1459_v28 = vpop.xlane.xlu1 %1458 }
 0xc51   : > { %v1460_v48 = vadd.f32 %v1459_v28, %v420_v42 }
 0xc53   : > { %1965 = vst.msk [vmem:[%s389_s12 + $0x4] sm:$0x3] %vm871_vm5, %v1460_v48 }
 0xcd9   : > { %v1754_v49 = vpop.xlane.xlu0 %1753 }
 0xcda   : > { %v1755_v50 = vadd.f32 %v1754_v49, %v420_v42 }
 0xcdc   : > { %1974 = vst.msk [vmem:[%s389_s12 + $0x6] sm:$0x3] %vm871_vm5, %v1755_v50 }
 0xcdd PF: > { %s21_s13 = sadd.s32 1, %s2127_s13  }
 0xcde   : > { %p18_p4 = scmp.ge.s32.totalorder %s21_s13, 4  }
 0xce0   :  { %20 = sbr.rel (!%p18_p4) target bundleno = 1 (0x1), region = 126 }

</bundles_post_ra>
